<compile_context>
chip_gen: v7x
topology: tpu7x:2x2x1
jax: 0.10.0
libtpu: 0.0.40
codegen_flags: <defaults>
</compile_context>

<pallas_src>
import numpy as np

import jax
import jax.numpy as jnp
from jax import lax
from jax.experimental import pallas as pl
from jax.experimental.pallas import tpu as pltpu


# --------------------------------------------------------------------------
# Kernel
# --------------------------------------------------------------------------
def _dlm_kernel(x_ref, b1_ref, bias1_ref, b2_ref, bias2_ref, out_ref, pad_ref):
    """One block of TB images per grid step.

    x_ref    : (TB, H, WC)   input tile, lane-dense (WC = W*C, multiple of 128)
    b*_ref   : (3, WC, WC)   block-banded folded conv+BN weights (per dy tap)
    bias*_ref: (1, WC)       folded conv-bias + BN bias, tiled over w
    out_ref  : (TB, H, WC)
    pad_ref  : (TB, H+2, WC) f32 VMEM scratch; rows 0 / H+1 of each image are
               the zero H-halo, shared by both convs.
    """
    TB, H, WC = x_ref.shape
    cdt = b1_ref.dtype                      # MXU operand dtype (bf16 or f32)

    # Zero only the per-image halo rows; the interior is fully overwritten by
    # each conv before its dy = +/-1 reads.
    halo = jnp.zeros((TB, 1, WC), jnp.float32)
    pad_ref[:, 0:1, :] = halo
    pad_ref[:, H + 1:H + 2, :] = halo

    def conv3x3(inp, b_ref, bias_ref):
        # inp: (TB, H, WC) f32.  Each dy tap is a single
        # (TB*H, WC) x (WC, WC) MXU matmul with f32 accumulation.
        lhs0 = inp.astype(cdt).reshape(TB * H, WC)
        acc = jnp.dot(lhs0, b_ref[1], preferred_element_type=jnp.float32)
        pad_ref[:, 1:H + 1, :] = inp
        up = pad_ref[:, 0:H, :].astype(cdt).reshape(TB * H, WC)
        dn = pad_ref[:, 2:H + 2, :].astype(cdt).reshape(TB * H, WC)
        acc = acc + jnp.dot(up, b_ref[0], preferred_element_type=jnp.float32)
        acc = acc + jnp.dot(dn, b_ref[2], preferred_element_type=jnp.float32)
        return (acc + bias_ref[...]).reshape(TB, H, WC)   # folded bias + BN

    x = x_ref[...]                                            # (TB, H, WC) f32
    y1 = jnp.maximum(conv3x3(x, b1_ref, bias1_ref), 0.0)      # ReLU(BN1(conv1))
    y2 = conv3x3(y1, b2_ref, bias2_ref)                       # BN2(conv2)
    out_ref[...] = jnp.maximum(y2 + x, 0.0).astype(out_ref.dtype)


# --------------------------------------------------------------------------
# Wrapper (NHWC-native; no HBM relayouts around the kernel)
# --------------------------------------------------------------------------
def _pick_tile_batch(n, h, target_rows=256):
    """TB images per grid step: aim for ~target_rows LHS rows per matmul to
    amortize the 128x128 weight load, but keep >= 2 grid steps so both v7x
    TensorCores get work (free on single-TC v5e/v6e)."""
    tb = max(1, target_rows // max(h, 1))
    if n >= 2:
        tb = min(tb, (n + 1) // 2)
    return min(tb, n)


def detail_local_module(x_nhwc, params):
    """NHWC in / NHWC out. NHWC -> (N, H, W*C) is a free contiguous reshape."""
    N, H, W, C = x_nhwc.shape
    WC = W * C
    assert WC % 128 == 0, "lane-dense layout needs W*C to be a multiple of 128"

    x_flat = x_nhwc.reshape(N, H, WC)
    TB = _pick_tile_batch(N, H)

    img_spec = pl.BlockSpec((TB, H, WC), lambda n: (n, 0, 0))
    band_spec = pl.BlockSpec((3, WC, WC), lambda n: (0, 0, 0))   # grid-constant
    bias_spec = pl.BlockSpec((1, WC), lambda n: (0, 0))          # grid-constant

    out_flat = pl.pallas_call(
        _dlm_kernel,
        out_shape=jax.ShapeDtypeStruct((N, H, WC), jnp.float32),
        grid_spec=pltpu.PrefetchScalarGridSpec(
            num_scalar_prefetch=0,
            grid=(pl.cdiv(N, TB),),
            in_specs=[
                img_spec,                 # x
                band_spec, bias_spec,     # conv1 + bn1 (folded)
                band_spec, bias_spec,     # conv2 + bn2 (folded)
            ],
            out_specs=img_spec,
            scratch_shapes=[pltpu.VMEM((TB, H + 2, WC), jnp.float32)],
        ),
        compiler_params=pltpu.CompilerParams(
            dimension_semantics=("parallel",)),
    )(x_flat, params["band1"], params["bias1"], params["band2"], params["bias2"])

    return out_flat.reshape(N, H, W, C)


def detail_local_module_nchw(x_nchw, params):
    """PyTorch-layout adapter (costs two HBM relayouts; prefer the NHWC API)."""
    out = detail_local_module(jnp.transpose(x_nchw, (0, 2, 3, 1)), params)
    return jnp.transpose(out, (0, 3, 1, 2))


# --------------------------------------------------------------------------
# Host-side parameter preparation: fold BN into conv, build banded weights
# --------------------------------------------------------------------------
def _fold_and_band(w_hwio, cb, gamma, beta, mean, var, w_width,
                   dtype=jnp.bfloat16, eps=1e-5):
    """Return (3, W*C, W*C) banded weight (in `dtype`) and (1, W*C) f32 bias.

    out[h, w*C+co] = sum_dy pad[h+dy] @ band[dy] + bias
    where pad[r] = x[r-1] (zero outside), and
    band[dy, w'*C+ci, w*C+co] = w_hwio[dy, w'-w+1, ci, co] * s[co] for |w'-w|<=1.
    """
    s = gamma / jnp.sqrt(var + eps)
    t = beta - mean * s
    w_f = np.asarray(w_hwio * s[None, None, None, :], np.float32)  # (3,3,C,C)
    b_f = np.asarray(cb * s + t, np.float32)                       # (C,)

    C = w_f.shape[2]
    WC = w_width * C
    band = np.zeros((3, WC, WC), np.float32)
    for dy in range(3):
        for dx in range(3):
            for w in range(w_width):
                wp = w + dx - 1            # source column w' = w + dx - 1
                if 0 <= wp < w_width:
                    band[dy, wp * C:(wp + 1) * C, w * C:(w + 1) * C] = w_f[dy, dx]
    bias_flat = np.tile(b_f, w_width).reshape(1, WC)               # idx = w*C+co
    return jnp.asarray(band, dtype), jnp.asarray(bias_flat, jnp.float32)


def _make_raw_params(key, dim):
    ks = jax.random.split(key, 12)
    return dict(
        w1=0.1 * jax.random.normal(ks[0], (3, 3, dim, dim), jnp.float32),  # HWIO
        w2=0.1 * jax.random.normal(ks[1], (3, 3, dim, dim), jnp.float32),
        cb1=0.1 * jax.random.normal(ks[2], (dim,), jnp.float32),
        cb2=0.1 * jax.random.normal(ks[3], (dim,), jnp.float32),
        g1=1.0 + 0.1 * jax.random.normal(ks[4], (dim,), jnp.float32),
        b1=0.1 * jax.random.normal(ks[5], (dim,), jnp.float32),
        m1=0.1 * jax.random.normal(ks[6], (dim,), jnp.float32),
        v1=1.0 + 0.1 * jax.random.uniform(ks[7], (dim,), jnp.float32),
        g2=1.0 + 0.1 * jax.random.normal(ks[8], (dim,), jnp.float32),
        b2=0.1 * jax.random.normal(ks[9], (dim,), jnp.float32),
        m2=0.1 * jax.random.normal(ks[10], (dim,), jnp.float32),
        v2=1.0 + 0.1 * jax.random.uniform(ks[11], (dim,), jnp.float32),
    )


def _prepare_params(raw, w_width, dtype=jnp.bfloat16):
    band1, bias1 = _fold_and_band(raw["w1"], raw["cb1"], raw["g1"], raw["b1"],
                                  raw["m1"], raw["v1"], w_width, dtype)
    band2, bias2 = _fold_and_band(raw["w2"], raw["cb2"], raw["g2"], raw["b2"],
                                  raw["m2"], raw["v2"], w_width, dtype)
    return dict(band1=band1, bias1=bias1, band2=band2, bias2=bias2)


# --------------------------------------------------------------------------
# Pure-JAX reference (unfused conv + bias + BN), eval-mode BN, NHWC
# --------------------------------------------------------------------------
def _reference(x_nhwc, raw, eps=1e-5):
    dn = ("NHWC", "HWIO", "NHWC")

    def conv_bn(inp, w, cb, g, b, m, v):
        y = lax.conv_general_dilated(inp, w, (1, 1), "SAME",
                                     dimension_numbers=dn)
        y = y + cb
        return (y - m) * (g / jnp.sqrt(v + eps)) + b

    y = jnp.maximum(conv_bn(x_nhwc, raw["w1"], raw["cb1"], raw["g1"],
                            raw["b1"], raw["m1"], raw["v1"]), 0.0)
    z = conv_bn(y, raw["w2"], raw["cb2"], raw["g2"], raw["b2"],
                raw["m2"], raw["v2"])
    return jnp.maximum(z + x_nhwc, 0.0)


if __name__ == "__main__":
    key = jax.random.PRNGKey(0)
    kx, kp = jax.random.split(key)

    # NHWC; W*C = 128 (lane-dense). N=8 -> TB=4 images per grid step, grid=(2,)
    # so both v7x TensorCores get work and each dy tap is a (64,128)x(128,128) dot.
    N, H, W, C = 8, 16, 16, 8
    x = jax.random.normal(kx, (N, H, W, C), jnp.float32)
    raw = _make_raw_params(kp, C)
    ref = jax.block_until_ready(_reference(x, raw))

    # Structural validation: f32 band weights, tight tolerance.
    out_f32 = jax.block_until_ready(
        detail_local_module(x, _prepare_params(raw, W, jnp.float32)))
    assert out_f32.shape == (N, H, W, C)
    err_f32 = float(jnp.max(jnp.abs(out_f32 - ref)))
    assert jnp.allclose(out_f32, ref, atol=1e-4, rtol=1e-4), err_f32

    # Performance path: bf16 MXU operands (f32 accumulate), relaxed tolerance.
    out_bf16 = jax.block_until_ready(
        detail_local_module(x, _prepare_params(raw, W, jnp.bfloat16)))
    err_bf16 = float(jnp.max(jnp.abs(out_bf16 - ref)))
    assert jnp.allclose(out_bf16, ref, atol=1e-1, rtol=5e-2), err_bf16

    print("KERNEL_OK")
</pallas_src>

<mosaic_0001>
module attributes {stable_mosaic.version = 11 : i64} {
  func.func @_dlm_kernel(%arg0: i32, %arg1: memref<4x16x128xf32, #tpu.memory_space<vmem>>, %arg2: memref<3x128x128xf32, #tpu.memory_space<vmem>>, %arg3: memref<1x128xf32, #tpu.memory_space<vmem>>, %arg4: memref<3x128x128xf32, #tpu.memory_space<vmem>>, %arg5: memref<1x128xf32, #tpu.memory_space<vmem>>, %arg6: memref<4x16x128xf32, #tpu.memory_space<vmem>>, %arg7: memref<4x18x128xf32, #tpu.memory_space<vmem>>) attributes {dimension_semantics = [#tpu.dimension_semantics<parallel>], iteration_bounds = array<i64: 2>, scalar_prefetch = 0 : i64, scratch_operands = 1 : i64, tpu.core_type = #tpu.core_type<tc>, window_params = [{transform_indices = @transform_0, window_bounds = array<i64: 4, 16, 128>}, {pipeline_mode = #tpu.pipeline_mode<synchronous>, transform_indices = @transform_1, window_bounds = array<i64: 3, 128, 128>}, {pipeline_mode = #tpu.pipeline_mode<synchronous>, transform_indices = @transform_2, window_bounds = array<i64: 1, 128>}, {pipeline_mode = #tpu.pipeline_mode<synchronous>, transform_indices = @transform_3, window_bounds = array<i64: 3, 128, 128>}, {pipeline_mode = #tpu.pipeline_mode<synchronous>, transform_indices = @transform_4, window_bounds = array<i64: 1, 128>}, {transform_indices = @transform_5, window_bounds = array<i64: 4, 16, 128>}]} {
    %cst = arith.constant 0.000000e+00 : f32
    %0 = vector.broadcast %cst : f32 to vector<4x1x128xf32>
    %c0 = arith.constant 0 : index
    %c0_0 = arith.constant 0 : index
    %c0_1 = arith.constant 0 : index
    %1 = vector.load %arg7[%c0, %c0_0, %c0_1] : memref<4x18x128xf32, #tpu.memory_space<vmem>>, vector<4x1x128xf32>
    tpu.vector_store %arg7[%c0, %c0_0, %c0_1], %0 {strides = array<i32>} : memref<4x18x128xf32, #tpu.memory_space<vmem>>, vector<4x1x128xf32>,
    %c0_2 = arith.constant 0 : index
    %c17 = arith.constant 17 : index
    %c0_3 = arith.constant 0 : index
    %2 = vector.load %arg7[%c0_2, %c17, %c0_3] : memref<4x18x128xf32, #tpu.memory_space<vmem>>, vector<4x1x128xf32>
    tpu.vector_store %arg7[%c0_2, %c17, %c0_3], %0 {strides = array<i32>} : memref<4x18x128xf32, #tpu.memory_space<vmem>>, vector<4x1x128xf32>,
    %c0_4 = arith.constant 0 : index
    %c0_5 = arith.constant 0 : index
    %c0_6 = arith.constant 0 : index
    %3 = vector.load %arg1[%c0_4, %c0_5, %c0_6] : memref<4x16x128xf32, #tpu.memory_space<vmem>>, vector<4x16x128xf32>
    %4 = vector.shape_cast %3 : vector<4x16x128xf32> to vector<64x128xf32>
    %c1 = arith.constant 1 : index
    %c0_7 = arith.constant 0 : index
    %c0_8 = arith.constant 0 : index
    %5 = vector.load %arg2[%c1, %c0_7, %c0_8] : memref<3x128x128xf32, #tpu.memory_space<vmem>>, vector<1x128x128xf32>
    %6 = vector.shape_cast %5 : vector<1x128x128xf32> to vector<128x128xf32>
    %cst_9 = arith.constant dense<0.000000e+00> : vector<64x128xf32>
    %7 = tpu.matmul %4, %6, %cst_9 {dimension_numbers = #tpu.dot_dimension_numbers<[1], [0], [0], [1], [0, 0, 1, 1], [], []>} : vector<64x128xf32>, vector<128x128xf32>, vector<64x128xf32> -> vector<64x128xf32>
    %c0_10 = arith.constant 0 : index
    %c1_11 = arith.constant 1 : index
    %c0_12 = arith.constant 0 : index
    %8 = vector.load %arg7[%c0_10, %c1_11, %c0_12] : memref<4x18x128xf32, #tpu.memory_space<vmem>>, vector<4x16x128xf32>
    tpu.vector_store %arg7[%c0_10, %c1_11, %c0_12], %3 {strides = array<i32>} : memref<4x18x128xf32, #tpu.memory_space<vmem>>, vector<4x16x128xf32>,
    %c0_13 = arith.constant 0 : index
    %c0_14 = arith.constant 0 : index
    %c0_15 = arith.constant 0 : index
    %9 = vector.load %arg7[%c0_13, %c0_14, %c0_15] : memref<4x18x128xf32, #tpu.memory_space<vmem>>, vector<4x16x128xf32>
    %10 = vector.shape_cast %9 : vector<4x16x128xf32> to vector<64x128xf32>
    %c0_16 = arith.constant 0 : index
    %c2 = arith.constant 2 : index
    %c0_17 = arith.constant 0 : index
    %11 = vector.load %arg7[%c0_16, %c2, %c0_17] : memref<4x18x128xf32, #tpu.memory_space<vmem>>, vector<4x16x128xf32>
    %12 = vector.shape_cast %11 : vector<4x16x128xf32> to vector<64x128xf32>
    %c0_18 = arith.constant 0 : index
    %c0_19 = arith.constant 0 : index
    %c0_20 = arith.constant 0 : index
    %13 = vector.load %arg2[%c0_18, %c0_19, %c0_20] : memref<3x128x128xf32, #tpu.memory_space<vmem>>, vector<1x128x128xf32>
    %14 = vector.shape_cast %13 : vector<1x128x128xf32> to vector<128x128xf32>
    %cst_21 = arith.constant dense<0.000000e+00> : vector<64x128xf32>
    %15 = tpu.matmul %10, %14, %cst_21 {dimension_numbers = #tpu.dot_dimension_numbers<[1], [0], [0], [1], [0, 0, 1, 1], [], []>} : vector<64x128xf32>, vector<128x128xf32>, vector<64x128xf32> -> vector<64x128xf32>
    %16 = arith.addf %7, %15 : vector<64x128xf32>
    %c2_22 = arith.constant 2 : index
    %c0_23 = arith.constant 0 : index
    %c0_24 = arith.constant 0 : index
    %17 = vector.load %arg2[%c2_22, %c0_23, %c0_24] : memref<3x128x128xf32, #tpu.memory_space<vmem>>, vector<1x128x128xf32>
    %18 = vector.shape_cast %17 : vector<1x128x128xf32> to vector<128x128xf32>
    %cst_25 = arith.constant dense<0.000000e+00> : vector<64x128xf32>
    %19 = tpu.matmul %12, %18, %cst_25 {dimension_numbers = #tpu.dot_dimension_numbers<[1], [0], [0], [1], [0, 0, 1, 1], [], []>} : vector<64x128xf32>, vector<128x128xf32>, vector<64x128xf32> -> vector<64x128xf32>
    %20 = arith.addf %16, %19 : vector<64x128xf32>
    %c0_26 = arith.constant 0 : index
    %c0_27 = arith.constant 0 : index
    %21 = vector.load %arg3[%c0_26, %c0_27] : memref<1x128xf32, #tpu.memory_space<vmem>>, vector<1x128xf32>
    %22 = vector.broadcast %21 : vector<1x128xf32> to vector<64x128xf32>
    %23 = arith.addf %20, %22 : vector<64x128xf32>
    %24 = vector.shape_cast %23 : vector<64x128xf32> to vector<4x16x128xf32>
    %cst_28 = arith.constant 0.000000e+00 : f32
    %25 = vector.broadcast %cst_28 : f32 to vector<4x16x128xf32>
    %26 = arith.maximumf %24, %25 : vector<4x16x128xf32>
    %27 = vector.shape_cast %26 : vector<4x16x128xf32> to vector<64x128xf32>
    %c1_29 = arith.constant 1 : index
    %c0_30 = arith.constant 0 : index
    %c0_31 = arith.constant 0 : index
    %28 = vector.load %arg4[%c1_29, %c0_30, %c0_31] : memref<3x128x128xf32, #tpu.memory_space<vmem>>, vector<1x128x128xf32>
    %29 = vector.shape_cast %28 : vector<1x128x128xf32> to vector<128x128xf32>
    %cst_32 = arith.constant dense<0.000000e+00> : vector<64x128xf32>
    %30 = tpu.matmul %27, %29, %cst_32 {dimension_numbers = #tpu.dot_dimension_numbers<[1], [0], [0], [1], [0, 0, 1, 1], [], []>} : vector<64x128xf32>, vector<128x128xf32>, vector<64x128xf32> -> vector<64x128xf32>
    %c0_33 = arith.constant 0 : index
    %c1_34 = arith.constant 1 : index
    %c0_35 = arith.constant 0 : index
    %31 = vector.load %arg7[%c0_33, %c1_34, %c0_35] : memref<4x18x128xf32, #tpu.memory_space<vmem>>, vector<4x16x128xf32>
    tpu.vector_store %arg7[%c0_33, %c1_34, %c0_35], %26 {strides = array<i32>} : memref<4x18x128xf32, #tpu.memory_space<vmem>>, vector<4x16x128xf32>,
    %c0_36 = arith.constant 0 : index
    %c0_37 = arith.constant 0 : index
    %c0_38 = arith.constant 0 : index
    %32 = vector.load %arg7[%c0_36, %c0_37, %c0_38] : memref<4x18x128xf32, #tpu.memory_space<vmem>>, vector<4x16x128xf32>
    %33 = vector.shape_cast %32 : vector<4x16x128xf32> to vector<64x128xf32>
    %c0_39 = arith.constant 0 : index
    %c2_40 = arith.constant 2 : index
    %c0_41 = arith.constant 0 : index
    %34 = vector.load %arg7[%c0_39, %c2_40, %c0_41] : memref<4x18x128xf32, #tpu.memory_space<vmem>>, vector<4x16x128xf32>
    %35 = vector.shape_cast %34 : vector<4x16x128xf32> to vector<64x128xf32>
    %c0_42 = arith.constant 0 : index
    %c0_43 = arith.constant 0 : index
    %c0_44 = arith.constant 0 : index
    %36 = vector.load %arg4[%c0_42, %c0_43, %c0_44] : memref<3x128x128xf32, #tpu.memory_space<vmem>>, vector<1x128x128xf32>
    %37 = vector.shape_cast %36 : vector<1x128x128xf32> to vector<128x128xf32>
    %cst_45 = arith.constant dense<0.000000e+00> : vector<64x128xf32>
    %38 = tpu.matmul %33, %37, %cst_45 {dimension_numbers = #tpu.dot_dimension_numbers<[1], [0], [0], [1], [0, 0, 1, 1], [], []>} : vector<64x128xf32>, vector<128x128xf32>, vector<64x128xf32> -> vector<64x128xf32>
    %39 = arith.addf %30, %38 : vector<64x128xf32>
    %c2_46 = arith.constant 2 : index
    %c0_47 = arith.constant 0 : index
    %c0_48 = arith.constant 0 : index
    %40 = vector.load %arg4[%c2_46, %c0_47, %c0_48] : memref<3x128x128xf32, #tpu.memory_space<vmem>>, vector<1x128x128xf32>
    %41 = vector.shape_cast %40 : vector<1x128x128xf32> to vector<128x128xf32>
    %cst_49 = arith.constant dense<0.000000e+00> : vector<64x128xf32>
    %42 = tpu.matmul %35, %41, %cst_49 {dimension_numbers = #tpu.dot_dimension_numbers<[1], [0], [0], [1], [0, 0, 1, 1], [], []>} : vector<64x128xf32>, vector<128x128xf32>, vector<64x128xf32> -> vector<64x128xf32>
    %43 = arith.addf %39, %42 : vector<64x128xf32>
    %c0_50 = arith.constant 0 : index
    %c0_51 = arith.constant 0 : index
    %44 = vector.load %arg5[%c0_50, %c0_51] : memref<1x128xf32, #tpu.memory_space<vmem>>, vector<1x128xf32>
    %45 = vector.broadcast %44 : vector<1x128xf32> to vector<64x128xf32>
    %46 = arith.addf %43, %45 : vector<64x128xf32>
    %47 = vector.shape_cast %46 : vector<64x128xf32> to vector<4x16x128xf32>
    %48 = arith.addf %47, %3 : vector<4x16x128xf32>
    %cst_52 = arith.constant 0.000000e+00 : f32
    %49 = vector.broadcast %cst_52 : f32 to vector<4x16x128xf32>
    %50 = arith.maximumf %48, %49 : vector<4x16x128xf32>
    %c0_53 = arith.constant 0 : index
    %c0_54 = arith.constant 0 : index
    %c0_55 = arith.constant 0 : index
    %51 = vector.load %arg6[%c0_53, %c0_54, %c0_55] : memref<4x16x128xf32, #tpu.memory_space<vmem>>, vector<4x16x128xf32>
    tpu.vector_store %arg6[%c0_53, %c0_54, %c0_55], %50 {strides = array<i32>} : memref<4x16x128xf32, #tpu.memory_space<vmem>>, vector<4x16x128xf32>,
    return
  }
  func.func @transform_0(%arg0: i32) -> (i32, i32, i32) {
    %c0_i32 = arith.constant 0 : i32
    %c0_i32_0 = arith.constant 0 : i32
    %c0_i32_1 = arith.constant 0 : i32
    return %arg0, %c0_i32, %c0_i32_0 : i32, i32, i32
  }
  func.func @transform_1(%arg0: i32) -> (i32, i32, i32) {
    %c0_i32 = arith.constant 0 : i32
    %c0_i32_0 = arith.constant 0 : i32
    %c0_i32_1 = arith.constant 0 : i32
    %c0_i32_2 = arith.constant 0 : i32
    return %c0_i32, %c0_i32_0, %c0_i32_1 : i32, i32, i32
  }
  func.func @transform_2(%arg0: i32) -> (i32, i32) {
    %c0_i32 = arith.constant 0 : i32
    %c0_i32_0 = arith.constant 0 : i32
    %c0_i32_1 = arith.constant 0 : i32
    return %c0_i32, %c0_i32_0 : i32, i32
  }
  func.func @transform_3(%arg0: i32) -> (i32, i32, i32) {
    %c0_i32 = arith.constant 0 : i32
    %c0_i32_0 = arith.constant 0 : i32
    %c0_i32_1 = arith.constant 0 : i32
    %c0_i32_2 = arith.constant 0 : i32
    return %c0_i32, %c0_i32_0, %c0_i32_1 : i32, i32, i32
  }
  func.func @transform_4(%arg0: i32) -> (i32, i32) {
    %c0_i32 = arith.constant 0 : i32
    %c0_i32_0 = arith.constant 0 : i32
    %c0_i32_1 = arith.constant 0 : i32
    return %c0_i32, %c0_i32_0 : i32, i32
  }
  func.func @transform_5(%arg0: i32) -> (i32, i32, i32) {
    %c0_i32 = arith.constant 0 : i32
    %c0_i32_0 = arith.constant 0 : i32
    %c0_i32_1 = arith.constant 0 : i32
    return %arg0, %c0_i32, %c0_i32_0 : i32, i32, i32
  }
}

</mosaic_0001>

<bundles_post_ra>
// kernel: tpu_custom_call.1
= control target key start
LH: loop header
LB: loop body
LE: loop exit
PB: predicated region body
PF: predicated region fallthrough
CT: control target
= control target key end

     0   :  { %10 = vsyncpa [#allocation4], 0  ;;  %s2551_s0 = inlined_call_operand.hbm [shape: f32[8,16,128], index: 0, kind: input, shape index: {}]   ;;  %s2552_s1 = inlined_call_operand.hbm [shape: f32[3,128,128], index: 1, kind: input, shape index: {}]   ;;  %s2553_s2 = inlined_call_operand.vmem [shape: f32[1,128], index: 2, kind: input, shape index: {}]   ;;  %s2554_s3 = inlined_call_operand.hbm [shape: f32[3,128,128], index: 3, kind: input, shape index: {}]   ;;  %s2555_s4 = inlined_call_operand.vmem [shape: f32[1,128], index: 4, kind: input, shape index: {}]   ;;  %s2556_s5 = inlined_call_operand.hbm [shape: f32[8,16,128], index: 5, kind: output, shape index: {}]  }
   0x1   :  { %12 = vsyncpa [#allocation4 + $0x1], 0 }
   0x2   :  { %13 = vsyncpa [#allocation7], 0 }
   0x3   :  { %14 = vsyncpa [#allocation5], 0 }
   0x4   :  { %16 = vsyncpa [#allocation5 + $0x1], 0  ;;  %s2181_s18 = smov 0   ;;  %s2183_s19 = smov 0  }
   0x5   :  { %s2185_s20 = smov 0   ;;  %s2187_s21 = smov 0  }
   0x6 LB: > { %s2202_s22 = sadd.s32 4294967295, %s2140_s21   ;;  %s1254_s23 = sadd.s32 4294967294, %s2140_s21   ;;  %s2140_s21 = sphi %s2187_s21, %s2576_s21   ;;  %s2136_s20 = sphi %s2185_s20, %s2575_s20   ;;  %s2132_s19 = sphi %s2183_s19, %s2574_s19   ;;  %s2128_s18 = sphi %s2181_s18, %s2573_s18  }
   0x7   : > { %p42_p0 = scmp.ne.s32.totalorder %s2132_s19, %s2128_s18  ;;  %p2557_p1 = scmp.eq.s32.totalorder %s2202_s22, 0 }
   0x8   : > { %p156_p3 = scmp.eq.s32.totalorder %s1254_s23, 1  ;;  %p1255_p5 = scmp.ge.s32.totalorder %s2140_s21, 1 }
   0x9   : > { %p2211_p4 = por %p2557_p1, %p42_p0  ;;  %p163_p7 = scmp.lt.s32.totalorder %s2140_s21, 3 }
   0xa   : > { %p2216_p6 = por %p156_p3, %p42_p0  ;;  %s2142_s27 = smov [#allocation6]  }
   0xb   : > { %s2560_s24 = scalar_select %p2211_p4, 1, 0 }
   0xc   : > { %s2561_s25 = scalar_select %p2216_p6, 1, 0 }
   0xd   : > { %p2221_p8 = pnand %p1255_p5, %p163_p7  ;;  %s175_s28 = sshll.u32 %s2142_s27, 4  ;;  %s2225_s28 = int_to_ptr.vmem [resolvable:$true] %s175_s28 }
   0xe   : > { %s2143_s30 = smov [#allocation8]   ;;  %s1984_s9 = scalar_lea.hbm %s2552_s1, 6144 }
   0xf   : > { %p1924_p9 = pneg %p2221_p8  ;;  %s191_s6 = sshll.u32 %s2143_s30, 4  ;;  %s2236_s6 = int_to_ptr.vmem [resolvable:$true] %s191_s6 }
  0x10   : > { %p1985_p12 = scmp.ne.s32.totalorder %s2552_s1, %s1984_s9  ;;  %p1991_p5 = scmp.lt.u32.totalorder %s1984_s9, %s2552_s1 }
  0x11   : > { %p2232_p11 = pnand %p1924_p9, %p2557_p1 }
  0x13   : > { %p1986_p13 = pneg %p2232_p11 }
  0x15   : > { %p1987_p0 = pnand %p1986_p13, %p1985_p12 }
  0x17   : > { %p1988_p3 = pneg %p1987_p0 }
  0x19   : > { %p1993_p7 = pnand %p1991_p5, %p1988_p3 }
  0x1b   : > { %1996 = shalt.err (!%p1993_p7)
}
  0x1c   : > { %s1997_s14 = scalar_lea.vmem %s2225_s28, 6144  ;;  %p2005_p2 = scmp.lt.s32.totalorder %s2225_s28, %s2225_s28 }
  0x1d   : > { %p1998_p9 = scmp.ne.s32.totalorder %s2225_s28, %s1997_s14  ;;  %p2006_p12 = scmp.lt.s32.totalorder %s1997_s14, %s1997_s14 }
  0x1f   : > { %p2000_p10 = pnand %p1998_p9, %p1986_p13  ;;  %p2007_p0 = por %p2006_p12, %p2005_p2 }
  0x21   : > { %p2001_p1 = pneg %p2000_p10 }
  0x23   : > { %p2008_p6 = pnand %p2007_p0, %p2001_p1 }
  0x25   : > { %2011 = shalt.err (!%p2008_p6)
}
  0x26   : > { %s2144_s15 = smov 128   ;;  %s2145_s16 = smov 8  }
  0x27   : > { %1927 = dma.hbm_to_vmem [thread:$0]  (!%p2232_p11), %s2552_s1, 6144, %s2225_s28, [#allocation7], %s2144_s15, %s2144_s15, %s2145_s16  }
  0x28   : > { %s2012_s7 = scalar_lea.hbm %s2554_s3, 6144 }
  0x29   : > { %p2013_p1 = scmp.ne.s32.totalorder %s2554_s3, %s2012_s7  ;;  %p2019_p10 = scmp.lt.u32.totalorder %s2012_s7, %s2554_s3 }
  0x2b   : > { %p2015_p2 = pnand %p2013_p1, %p1986_p13 }
  0x2d   : > { %p2016_p6 = pneg %p2015_p2 }
  0x2f   : > { %p2021_p3 = pnand %p2019_p10, %p2016_p6 }
  0x31   : > { %2024 = shalt.err (!%p2021_p3)
}
  0x32   : > { %s2025_s28 = scalar_lea.vmem %s2236_s6, 6144  ;;  %p2033_p12 = scmp.lt.s32.totalorder %s2236_s6, %s2236_s6 }
  0x33   : > { %p2026_p5 = scmp.ne.s32.totalorder %s2236_s6, %s2025_s28  ;;  %p2034_p0 = scmp.lt.s32.totalorder %s2025_s28, %s2025_s28 }
  0x35   : > { %p2028_p7 = pnand %p2026_p5, %p1986_p13  ;;  %p2035_p1 = por %p2034_p0, %p2033_p12 }
  0x37   : > { %p2029_p9 = pneg %p2028_p7 }
  0x39   : > { %p2036_p2 = pnand %p2035_p1, %p2029_p9 }
  0x3b   : > { %2039 = shalt.err (!%p2036_p2)
}
  0x3c   : > { %1930 = dma.hbm_to_vmem [thread:$0]  (!%p2232_p11), %s2554_s3, 6144, %s2236_s6, [#allocation7], %s2144_s15, %s2144_s15, %s2145_s16  }
  0x3d   : > { %s2297_s29 = sadd.s32 1, %s2140_s21   ;;  %s29_s14 = sadd.s32 1, %s2136_s20 }
  0x3e   : > { %s26_s17 = ssub.s32 %s2140_s21, %s2297_s29  ;;  %p36_p13 = scmp.ne.s32.totalorder %s2136_s20, %s2132_s19 }
  0x3f   : > { %p27_p6 = scmp.eq.s32.totalorder %s26_s17, 0  ;;  %p37_p10 = scmp.eq.s32.totalorder %s2140_s21, 0 }
  0x40   : > { %p2564_p3 = scmp.eq.s32.totalorder %s2202_s22, 1  ;;  %p1941_p7 = scmp.lt.s32.totalorder %s2140_s21, 2 }
  0x41   : > { %s2313_s27 = scalar_select %p27_p6, %s2136_s20, %s29_s14  }
  0x42   : > { %p2307_p5 = por %p2564_p3, %p36_p13  ;;  %p38_p9 = por %p37_p10, %p36_p13 }
  0x43   : > { %s208_s30 = sand.u32 1, %s2136_s20   ;;  %s1277_s6 = sshll.u32 %s2140_s21, 10 }
  0x44   : > { %s2565_s23 = scalar_select %p2307_p5, 1, 0 }
  0x45   : > { %s1259_s7 = sshll.u32 %s208_s30, 6  ;;  %s2320_s10 = scalar_lea.hbm %s2551_s0, %s1277_s6 }
  0x46   : > { %s212_s11 = scalar_lea.vmem [#allocation3], %s1259_s7  ;;  %p2324_p11 = pnand %p1941_p7, %p38_p9 }
  0x47   : > { %s220_s28 = sshll.u32 %s212_s11, 4  ;;  %s2328_s13 = scalar_lea.sflag [#allocation4], %s208_s30  ;;  %s2322_s28 = int_to_ptr.vmem [resolvable:$true] %s220_s28 }
  0x48   : > { %s2040_s14 = scalar_lea.hbm %s2320_s10, 1024  ;;  %p2042_p0 = pneg %p2324_p11 }
  0x49   : > { %p2041_p12 = scmp.ne.s32.totalorder %s2320_s10, %s2040_s14  ;;  %s2045_s6 = scalar_lea.hbm %s2551_s0, 2048 }
  0x4a   : > { %p2046_p13 = scmp.lt.u32.totalorder %s2320_s10, %s2551_s0  ;;  %p2047_p6 = scmp.lt.u32.totalorder %s2045_s6, %s2040_s14 }
  0x4b   : > { %p2043_p1 = pnand %p2042_p0, %p2041_p12  ;;  %p2049_p3 = scmp.lt.u32.totalorder %s2040_s14, %s2320_s10 }
  0x4c   : > { %p2048_p10 = por %p2047_p6, %p2046_p13 }
  0x4d   : > { %p2044_p2 = pneg %p2043_p1 }
  0x4e   : > { %p2050_p7 = por %p2049_p3, %p2048_p10 }
  0x50   : > { %p2051_p9 = pnand %p2050_p7, %p2044_p2 }
  0x52   : > { %2054 = shalt.err (!%p2051_p9)
}
  0x53   : > { %s2055_s30 = scalar_lea.vmem %s2322_s28, 1024  ;;  %s2146_s11 = smov [#allocation3]  }
  0x54   : > { %p2056_p12 = scmp.ne.s32.totalorder %s2322_s28, %s2055_s30  ;;  %s2060_s17 = sshll.u32 %s2146_s11, 4  ;;  %s2061_s17 = int_to_ptr.vmem [resolvable:$false] %s2060_s17 }
  0x55   : > { %s2062_s7 = scalar_lea.vmem %s2061_s17, 2048  ;;  %p2063_p4 = scmp.lt.s32.totalorder %s2322_s28, %s2061_s17 }
  0x56   : > { %p2058_p1 = pnand %p2056_p12, %p2042_p0  ;;  %p2064_p13 = scmp.lt.s32.totalorder %s2062_s7, %s2055_s30 }
  0x58   : > { %p2059_p5 = pneg %p2058_p1  ;;  %p2065_p6 = por %p2064_p13, %p2063_p4 }
  0x5a   : > { %p2066_p10 = pnand %p2065_p6, %p2059_p5 }
  0x5c   : > { %2069 = shalt.err (!%p2066_p10)
}
  0x5d   : > { %1934 = dma.hbm_to_vmem [thread:$0]  (!%p2324_p11), %s2320_s10, 1024, %s2322_s28, %s2328_s13, %s2144_s15, %s2144_s15, %s2145_s16  }
  0x5e   : > { %232 = sbr.rel (%p2221_p8) target bundleno = 740 (0x2e4), region = 40  ;;  %s2362_s14 = sand.u32 (!%p2221_p8), 1, %s2132_s19  }
  0x5f   : > { %s1264_s6 = sshll.u32 (!%p2221_p8), %s2362_s14, 6  ;;  %s235_s8 = scalar_lea.sflag (!%p2221_p8), [#allocation4], %s2362_s14 }
  0x60   : > { %s2368_s12 = scalar_lea.vmem (!%p2221_p8), [#allocation3], %s1264_s6  ;;  %p2567_p4 = scmp.ne.s32.totalorder (!%p2221_p8), %s2560_s24, 0 }
  0x65   : > { %2115 = dma.done.wait (%p2567_p4), %s235_s8, 1024  }
  0x66   : > { %2117 = vsyncadd (%p2567_p4), %s235_s8, 4294966272  ;;  %p2568_p5 = scmp.eq.s32.totalorder %s2202_s22, 0 }
  0x68   : > { %2119 = dma.done.wait (%p2568_p5), [#allocation7], 12288   ;;  %p2569_p8 = pmov %p2568_p5 }
  0x69   : > { %v2147_v0 = vmov 0.0   ;;  %v332_v1 = vld [vmem:[#allocation6] sm:$0xff]  ;;  %v333_v2 = vld [vmem:[#allocation6 + $0x8] sm:$0xff]  ;;  %v334_v3 = vld [vmem:[#allocation6 + $0x10] sm:$0xff]  ;;  %s2484_s10 = scalar_lea.vmem [#allocation9], %s1264_s6  ;;  %s1279_s13 = sshll.u32 %s2202_s22, 10 }
  0x6a   : > { %2121 = vsyncadd (%p2569_p8), [#allocation7], 4294955008  ;;  %275 = vst [vmem:[#allocation2] sm:$0x1] %v2147_v0  ;;  %v1688_v4 = vpack.c.bf16 %v333_v2, %v332_v1  ;;  %v335_v5 = vld [vmem:[#allocation6 + $0x18] sm:$0xff]  ;;  %v336_v7 = vld [vmem:[#allocation6 + $0x20] sm:$0xff]  ;;  %s2505_s11 = scalar_lea.hbm %s2556_s5, %s1279_s13 }
  0x6b   : > { %276 = vst [vmem:[#allocation2 + $0x18] sm:$0x1] %v2147_v0  ;;  %277 = vst [vmem:[#allocation2 + $0x30] sm:$0x1] %v2147_v0  ;;  %v1692_v6 = vpack.c.bf16 %v335_v5, %v334_v3  ;;  %v337_v8 = vld [vmem:[#allocation6 + $0x28] sm:$0xff]  ;;  %v2379_v10 = vld [vmem:[%s2368_s12] sm:$0xff] }
  0x6c   : > { %278 = vst [vmem:[#allocation2 + $0x48] sm:$0x1] %v2147_v0  ;;  %279 = vst [vmem:[#allocation2 + $0x11] sm:$0x1] %v2147_v0  ;;  %1689 = vmatprep.subr.bf16.mxu0 %v1688_v4  ;;  %v1696_v9 = vpack.c.bf16 %v337_v8, %v336_v7  ;;  %v338_v11 = vld [vmem:[#allocation6 + $0x30] sm:$0xff]  ;;  %v339_v12 = vld [vmem:[#allocation6 + $0x38] sm:$0xff] }
  0x6d   : > { %280 = vst [vmem:[#allocation2 + $0x29] sm:$0x1] %v2147_v0  ;;  %281 = vst [vmem:[#allocation2 + $0x41] sm:$0x1] %v2147_v0  ;;  %1691 = vmatpush3.bf16.msra.mxu0 %v1688_v4  ;;  %v2383_v13 = vld [vmem:[%s2368_s12 + $0x8] sm:$0xff]  ;;  %v1700_v14 = vpack.c.bf16 %v339_v12, %v338_v11  ;;  %v340_v15 = vld [vmem:[#allocation6 + $0x40] sm:$0xff] }
  0x6e   : > { %282 = vst [vmem:[#allocation2 + $0x59] sm:$0x1] %v2147_v0  ;;  %1693 = vmatprep.subr.bf16.mxu0 %v1692_v6  ;;  %308 = vst [vmem:[#allocation2 + $0x1] sm:$0xff] %v2379_v10  ;;  %v2387_v16 = vld [vmem:[%s2368_s12 + $0x10] sm:$0xff]  ;;  %v341_v17 = vld [vmem:[#allocation6 + $0x48] sm:$0xff]  ;;  %s1162_s28 = sshll.u32 %s2484_s10, 4  ;;  %s2498_s28 = int_to_ptr.vmem [resolvable:$true] %s1162_s28 }
  0x6f   : > { %309 = vst [vmem:[#allocation2 + $0x9] sm:$0xff] %v2383_v13  ;;  %310 = vst [vmem:[#allocation2 + $0x19] sm:$0xff] %v2387_v16  ;;  %v2391_v18 = vld [vmem:[%s2368_s12 + $0x18] sm:$0xff]  ;;  %v2394_v19 = vld [vmem:[%s2368_s12 + $0x20] sm:$0xff]  ;;  %v1704_v22 = vpack.c.bf16 %v341_v17, %v340_v15  ;;  %s1148_s22 = scalar_lea.sflag [#allocation5], %s2362_s14  ;;  %s2070_s17 = scalar_lea.vmem %s2498_s28, 1024 }
  0x70   : > { %311 = vst [vmem:[#allocation2 + $0x21] sm:$0xff] %v2391_v18  ;;  %312 = vst [vmem:[#allocation2 + $0x31] sm:$0xff] %v2394_v19  ;;  %v2399_v20 = vld [vmem:[%s2368_s12 + $0x28] sm:$0xff]  ;;  %v2403_v21 = vld [vmem:[%s2368_s12 + $0x30] sm:$0xff]  ;;  %p2071_p11 = scmp.ne.s32.totalorder %s2498_s28, %s2070_s17  ;;  %p2570_p0 = scmp.ne.s32.totalorder %s2565_s23, 0 }
  0x71   : > { %1695 = vmatpush3.bf16.msra.mxu0 %v1692_v6  ;;  %313 = vst [vmem:[#allocation2 + $0x39] sm:$0xff] %v2399_v20  ;;  %314 = vst [vmem:[#allocation2 + $0x49] sm:$0xff] %v2403_v21  ;;  %v2407_v24 = vld [vmem:[%s2368_s12 + $0x38] sm:$0xff]  ;;  %v342_v25 = vld [vmem:[#allocation6 + $0x50] sm:$0xff]  ;;  %s2148_s7 = smov [#allocation9]  }
  0x72   : > { %1697 = vmatprep.subr.bf16.mxu0 %v1696_v9  ;;  %v343_v26 = vld [vmem:[#allocation6 + $0x58] sm:$0xff]  ;;  %315 = vst [vmem:[#allocation2 + $0x51] sm:$0xff] %v2407_v24  ;;  %v344_v28 = vld [vmem:[#allocation6 + $0x60] sm:$0xff]  ;;  %v345_v29 = vld [vmem:[#allocation6 + $0x68] sm:$0xff]  ;;  %p2072_p2 = pnand %p2071_p11, %p2570_p0  ;;  %s2074_s6 = sshll.u32 %s2148_s7, 4  ;;  %s2075_s6 = int_to_ptr.vmem [resolvable:$false] %s2074_s6 }
  0x73   : > { %v1708_v27 = vpack.c.bf16 %v343_v26, %v342_v25  ;;  %v1712_v30 = vpack.c.bf16 %v345_v29, %v344_v28  ;;  %v346_v31 = vld [vmem:[#allocation6 + $0x70] sm:$0xff]  ;;  %v347_v32 = vld [vmem:[#allocation6 + $0x78] sm:$0xff]  ;;  %v752_v33 = vld [vmem:[#allocation8] sm:$0xff]  ;;  %s2076_s8 = scalar_lea.vmem %s2075_s6, 2048  ;;  %p2077_p7 = scmp.lt.s32.totalorder %s2498_s28, %s2075_s6 }
  0x74   : > { %v753_v34 = vld [vmem:[#allocation8 + $0x8] sm:$0xff]  ;;  %v754_v35 = vld [vmem:[#allocation8 + $0x10] sm:$0xff]  ;;  %v1716_v36 = vpack.c.bf16 %v347_v32, %v346_v31  ;;  %v292_v37 = vld [vmem:[#allocation6 + $0x80] sm:$0xff]  ;;  %p2073_p3 = pneg %p2072_p2  ;;  %p2078_p9 = scmp.lt.s32.totalorder %s2076_s8, %s2070_s17 }
  0x75   : > { %1699 = vmatpush3.bf16.msra.mxu0 %v1696_v9  ;;  %v316_v23 = vld [vmem:[#allocation2] sm:$0xff]  ;;  %v1784_v38 = vpack.c.bf16 %v753_v34, %v752_v33  ;;  %v755_v39 = vld [vmem:[#allocation8 + $0x18] sm:$0xff]  ;;  %v293_v40 = vld [vmem:[#allocation6 + $0x88] sm:$0xff] }
  0x76   : > { %1701 = vmatprep.subr.bf16.mxu0 %v1700_v14  ;;  %1456 = vmatprep.mubr.f32.mxu0 %v316_v23  ;;  %v1788_v41 = vpack.c.bf16 %v755_v39, %v754_v35  ;;  %v756_v42 = vld [vmem:[#allocation8 + $0x20] sm:$0xff]  ;;  %v757_v43 = vld [vmem:[#allocation8 + $0x28] sm:$0xff]  ;;  %v1720_v44 = vpack.c.bf16 %v293_v40, %v292_v37  ;;  %v294_v46 = vld [vmem:[#allocation6 + $0x90] sm:$0xff]  ;;  %p2079_p12 = por %p2078_p9, %p2077_p7 }
  0x77   : > { %1785 = vmatprep.subr.bf16.mxu1 %v1784_v38  ;;  %v1792_v45 = vpack.c.bf16 %v757_v43, %v756_v42  ;;  %v295_v47 = vld [vmem:[#allocation6 + $0x98] sm:$0xff]  ;;  %v758_v48 = vld [vmem:[#allocation8 + $0x30] sm:$0xff]  ;;  %v317_v50 = vld [vmem:[#allocation2 + $0x8] sm:$0xff] }
  0x78   : > { %1787 = vmatpush3.bf16.msra.mxu1 %v1784_v38  ;;  %v759_v49 = vld [vmem:[#allocation8 + $0x38] sm:$0xff]  ;;  %v1724_v51 = vpack.c.bf16 %v295_v47, %v294_v46  ;;  %v296_v53 = vld [vmem:[#allocation6 + $0xa0] sm:$0xff]  ;;  %v297_v54 = vld [vmem:[#allocation6 + $0xa8] sm:$0xff]  ;;  %p2080_p1 = pnand %p2079_p12, %p2073_p3 }
  0x79   : > { %1703 = vmatpush3.bf16.msra.mxu0 %v1700_v14  ;;  %1789 = vmatprep.subr.bf16.mxu1 %v1788_v41  ;;  %v318_v52 = vld [vmem:[#allocation2 + $0x18] sm:$0xff]  ;;  %v1796_v55 = vpack.c.bf16 %v759_v49, %v758_v48  ;;  %v760_v56 = vld [vmem:[#allocation8 + $0x40] sm:$0xff]  ;;  %v761_v57 = vld [vmem:[#allocation8 + $0x48] sm:$0xff]  ;;  %v1728_v59 = vpack.c.bf16 %v297_v54, %v296_v53 }
  0x7a   : > { %1705 = vmatprep.subr.bf16.mxu0 %v1704_v22  ;;  %v319_v58 = vld [vmem:[#allocation2 + $0x20] sm:$0xff]  ;;  %v320_v60 = vld [vmem:[#allocation2 + $0x30] sm:$0xff]  ;;  %v299_v62 = vld [vmem:[#allocation6 + $0xb8] sm:$0xff]  ;;  %v1800_v63 = vpack.c.bf16 %v761_v57, %v760_v56 }
  0x7b   : > { %v298_v61 = vld [vmem:[#allocation6 + $0xb0] sm:$0xff]  ;;  %v321_v0 = vld [vmem:[#allocation2 + $0x38] sm:$0xff]  ;;  %v322_v2 = vld [vmem:[#allocation2 + $0x48] sm:$0xff] }
  0x7c   : > { %1791 = vmatpush3.bf16.msra.mxu1 %v1788_v41  ;;  %v1732_v1 = vpack.c.bf16 %v299_v62, %v298_v61  ;;  %v300_v3 = vld [vmem:[#allocation6 + $0xc0] sm:$0xff]  ;;  %v301_v4 = vld [vmem:[#allocation6 + $0xc8] sm:$0xff]  ;;  %v323_v5 = vld [vmem:[#allocation2 + $0x50] sm:$0xff] }
  0x7d   : > { %1707 = vmatpush3.bf16.msra.mxu0 %v1704_v22  ;;  %1793 = vmatprep.subr.bf16.mxu1 %v1792_v45  ;;  %v1736_v6 = vpack.c.bf16 %v301_v4, %v300_v3  ;;  %v302_v7 = vld [vmem:[#allocation6 + $0xd0] sm:$0xff]  ;;  %v303_v8 = vld [vmem:[#allocation6 + $0xd8] sm:$0xff]  ;;  %v304_v11 = vld [vmem:[#allocation6 + $0xe0] sm:$0xff] }
  0x7e   : > { %1709 = vmatprep.subr.bf16.mxu0 %v1708_v27  ;;  %v1740_v9 = vpack.c.bf16 %v303_v8, %v302_v7  ;;  %v305_v12 = vld [vmem:[#allocation6 + $0xe8] sm:$0xff]  ;;  %v306_v15 = vld [vmem:[#allocation6 + $0xf0] sm:$0xff]  ;;  %v307_v17 = vld [vmem:[#allocation6 + $0xf8] sm:$0xff] }
  0x7f   : > { %v1744_v14 = vpack.c.bf16 %v305_v12, %v304_v11  ;;  %v1748_v22 = vpack.c.bf16 %v307_v17, %v306_v15  ;;  %v559_v23 = vld [vmem:[#allocation6 + $0x100] sm:$0xff]  ;;  %v560_v25 = vld [vmem:[#allocation6 + $0x108] sm:$0xff]  ;;  %v562_v28 = vld [vmem:[#allocation6 + $0x118] sm:$0xff] }
  0x80   : > { %1795 = vmatpush3.bf16.msra.mxu1 %v1792_v45  ;;  %v1752_v26 = vpack.c.bf16 %v560_v25, %v559_v23  ;;  %v564_v31 = vld [vmem:[#allocation6 + $0x128] sm:$0xff]  ;;  %v565_v33 = vld [vmem:[#allocation6 + $0x130] sm:$0xff]  ;;  %v566_v34 = vld [vmem:[#allocation6 + $0x138] sm:$0xff] }
  0x81   : > { %1711 = vmatpush3.bf16.msra.mxu0 %v1708_v27  ;;  %1797 = vmatprep.subr.bf16.mxu1 %v1796_v55  ;;  %v561_v27 = vld [vmem:[#allocation6 + $0x110] sm:$0xff]  ;;  %v1764_v35 = vpack.c.bf16 %v566_v34, %v565_v33  ;;  %v568_v37 = vld [vmem:[#allocation6 + $0x148] sm:$0xff]  ;;  %v570_v41 = vld [vmem:[#allocation6 + $0x158] sm:$0xff] }
  0x82   : > { %1713 = vmatprep.subr.bf16.mxu0 %v1712_v30  ;;  %v1756_v29 = vpack.c.bf16 %v562_v28, %v561_v27  ;;  %v324_v39 = vld [vmem:[#allocation2 + $0x2] sm:$0xff]  ;;  %v569_v40 = vld [vmem:[#allocation6 + $0x150] sm:$0xff]  ;;  %v574_v47 = vld [vmem:[#allocation6 + $0x178] sm:$0xff] }
  0x83   : > { %v1772_v42 = vpack.c.bf16 %v570_v41, %v569_v40  ;;  %v571_v43 = vld [vmem:[#allocation6 + $0x160] sm:$0xff]  ;;  %v573_v46 = vld [vmem:[#allocation6 + $0x170] sm:$0xff]  ;;  %v763_v57 = vld [vmem:[#allocation8 + $0x58] sm:$0xff] }
  0x84   : > { %1799 = vmatpush3.bf16.msra.mxu1 %v1796_v55  ;;  %v1780_v48 = vpack.c.bf16 %v574_v47, %v573_v46  ;;  %v325_v49 = vld [vmem:[#allocation2 + $0xa] sm:$0xff]  ;;  %v329_v53 = vld [vmem:[#allocation2 + $0x3a] sm:$0xff]  ;;  %v331_v55 = vld [vmem:[#allocation2 + $0x52] sm:$0xff] }
  0x85   : > { %1715 = vmatpush3.bf16.msra.mxu0 %v1712_v30  ;;  %1801 = vmatprep.subr.bf16.mxu1 %v1800_v63  ;;  %v563_v30 = vld [vmem:[#allocation6 + $0x120] sm:$0xff]  ;;  %v330_v54 = vld [vmem:[#allocation2 + $0x4a] sm:$0xff] }
  0x86   : > { %1717 = vmatprep.subr.bf16.mxu0 %v1716_v36  ;;  %v1760_v32 = vpack.c.bf16 %v564_v31, %v563_v30  ;;  %v762_v56 = vld [vmem:[#allocation8 + $0x50] sm:$0xff]  ;;  %v1268_v4 = vld [vmem:[%s2553_s2] ss:$0 sm:$0xff]  ;;  %v715_v30 = vld [vmem:[#allocation8 + $0x98] sm:$0xff] }
  0x87   : > { %v766_v62 = vld [vmem:[#allocation8 + $0x70] sm:$0xff]  ;;  %v716_v40 = vld [vmem:[#allocation8 + $0xa0] sm:$0xff]  ;;  %v717_v41 = vld [vmem:[#allocation8 + $0xa8] sm:$0xff] }
  0x88   : > { %1803 = vmatpush3.bf16.msra.mxu1 %v1800_v63  ;;  %v767_v63 = vld [vmem:[#allocation8 + $0x78] sm:$0xff]  ;;  %v1824_v46 = vpack.c.bf16 %v717_v41, %v716_v40  ;;  %v718_v47 = vld [vmem:[#allocation8 + $0xb0] sm:$0xff] }
  0x89   : > { %1719 = vmatpush3.bf16.msra.mxu0 %v1716_v36  ;;  %v567_v36 = vld [vmem:[#allocation6 + $0x140] sm:$0xff] }
  0x8a   : > { %1721 = vmatprep.subr.bf16.mxu0 %v1720_v44  ;;  %v1768_v38 = vpack.c.bf16 %v568_v37, %v567_v36 }
  0x8c   : > { %1457 = vmatmul.mubr.f32.vlgmr.msra.gmra.mrb[0].mxu0 %v317_v50  ;;  %v326_v50 = vld [vmem:[#allocation2 + $0x1a] sm:$0xff] }
  0x8d   : > { %1723 = vmatpush3.bf16.msra.mxu0 %v1720_v44  ;;  %1459 = vmatprep.mubr.f32.mxu0 %v318_v52  ;;  %v572_v44 = vld [vmem:[#allocation6 + $0x168] sm:$0xff]  ;;  %v328_v52 = vld [vmem:[#allocation2 + $0x32] sm:$0xff] }
  0x8e   : > { %1725 = vmatprep.subr.bf16.mxu0 %v1724_v51  ;;  %v1776_v45 = vpack.c.bf16 %v572_v44, %v571_v43 }
  0x90   : > { %1460 = vmatmul.mubr.f32.gmra.mrb[2].mxu0 %v319_v58  ;;  %v1804_v58 = vpack.c.bf16 %v763_v57, %v762_v56  ;;  %v722_v57 = vld [vmem:[#allocation8 + $0xd0] sm:$0xff] }
  0x91   : > { %1727 = vmatpush3.bf16.msra.mxu0 %v1724_v51  ;;  %1462 = vmatprep.mubr.f32.mxu0 %v320_v60  ;;  %v327_v51 = vld [vmem:[#allocation2 + $0x22] sm:$0xff] }
  0x92   : > { %1729 = vmatprep.subr.bf16.mxu0 %v1728_v59  ;;  %1805 = vmatprep.subr.bf16.mxu1 %v1804_v58  ;;  %v765_v60 = vld [vmem:[#allocation8 + $0x68] sm:$0xff] }
  0x93   : > { %1807 = vmatpush3.bf16.msra.mxu1 %v1804_v58  ;;  %v723_v58 = vld [vmem:[#allocation8 + $0xd8] sm:$0xff] }
  0x94   : > { %1463 = vmatmul.mubr.f32.gmra.mrb[4].mxu0 %v321_v0  ;;  %v1812_v0 = vpack.c.bf16 %v767_v63, %v766_v62  ;;  %v726_v63 = vld [vmem:[#allocation8 + $0xf0] sm:$0xff] }
  0x95   : > { %1731 = vmatpush3.bf16.msra.mxu0 %v1728_v59  ;;  %1465 = vmatprep.mubr.f32.mxu0 %v322_v2  ;;  %v764_v59 = vld [vmem:[#allocation8 + $0x60] sm:$0xff]  ;;  %v713_v2 = vld [vmem:[#allocation8 + $0x88] sm:$0xff] }
  0x96   : > { %1733 = vmatprep.subr.bf16.mxu0 %v1732_v1  ;;  %v1808_v61 = vpack.c.bf16 %v765_v60, %v764_v59  ;;  %v1836_v59 = vpack.c.bf16 %v723_v58, %v722_v57  ;;  %v724_v60 = vld [vmem:[#allocation8 + $0xe0] sm:$0xff] }
  0x98   : > { %1466 = vmatmul.mubr.f32.gmra.mrb[6].mxu0 %v323_v5  ;;  %1809 = vmatprep.subr.bf16.mxu1 %v1808_v61 }
  0x99   : > { %1735 = vmatpush3.bf16.msra.mxu0 %v1732_v1  ;;  %1500 = vmatprep.mubr.f32.mxu0 %v2379_v10  ;;  %v712_v1 = vld [vmem:[#allocation8 + $0x80] sm:$0xff] }
  0x9a   : > { %1737 = vmatprep.subr.bf16.mxu0 %v1736_v6  ;;  %1811 = vmatpush3.bf16.msra.mxu1 %v1808_v61  ;;  %v1816_v3 = vpack.c.bf16 %v713_v2, %v712_v1  ;;  %v725_v61 = vld [vmem:[#allocation8 + $0xe8] sm:$0xff]  ;;  %v979_v2 = vld [vmem:[#allocation8 + $0x100] sm:$0xff] }
  0x9b   : > { %1813 = vmatprep.subr.bf16.mxu1 %v1812_v0  ;;  %v1840_v62 = vpack.c.bf16 %v725_v61, %v724_v60 }
  0x9d   : > { %1739 = vmatpush3.bf16.msra.mxu0 %v1736_v6 }
  0x9e   : > { %1741 = vmatprep.subr.bf16.mxu0 %v1740_v9  ;;  %1815 = vmatpush3.bf16.msra.mxu1 %v1812_v0  ;;  %v727_v0 = vld [vmem:[#allocation8 + $0xf8] sm:$0xff] }
  0x9f   : > { %1817 = vmatprep.subr.bf16.mxu1 %v1816_v3  ;;  %v1844_v1 = vpack.c.bf16 %v727_v0, %v726_v63 }
  0xa1   : > { %1743 = vmatpush3.bf16.msra.mxu0 %v1740_v9 }
  0xa2   : > { %1745 = vmatprep.subr.bf16.mxu0 %v1744_v14 }
  0xa5   : > { %1747 = vmatpush3.bf16.msra.mxu0 %v1744_v14 }
  0xa6   : > { %1749 = vmatprep.subr.bf16.mxu0 %v1748_v22 }
  0xa9   : > { %1751 = vmatpush3.bf16.msra.mxu0 %v1748_v22 }
  0xaa   : > { %1753 = vmatprep.subr.bf16.mxu0 %v1752_v26 }
  0xac   : > { %1501 = vmatmul.mubr.f32.vlgmr.msra.gmra.mrb[0].mxu0 %v2383_v13 }
  0xad   : > { %1755 = vmatpush3.bf16.msra.mxu0 %v1752_v26  ;;  %1503 = vmatprep.mubr.f32.mxu0 %v2387_v16 }
  0xae   : > { %1757 = vmatprep.subr.bf16.mxu0 %v1756_v29 }
  0xb0   : > { %1504 = vmatmul.mubr.f32.gmra.mrb[2].mxu0 %v2391_v18 }
  0xb1   : > { %1759 = vmatpush3.bf16.msra.mxu0 %v1756_v29  ;;  %1506 = vmatprep.mubr.f32.mxu0 %v2394_v19  ;;  %v714_v29 = vld [vmem:[#allocation8 + $0x90] sm:$0xff] }
  0xb2   : > { %1761 = vmatprep.subr.bf16.mxu0 %v1760_v32 }
  0xb4   : > { %1507 = vmatmul.mubr.f32.gmra.mrb[4].mxu0 %v2399_v20 }
  0xb5   : > { %1763 = vmatpush3.bf16.msra.mxu0 %v1760_v32  ;;  %1509 = vmatprep.mubr.f32.mxu0 %v2403_v21 }
  0xb6   : > { %1765 = vmatprep.subr.bf16.mxu0 %v1764_v35 }
  0xb8   : > { %1510 = vmatmul.mubr.f32.gmra.mrb[6].mxu0 %v2407_v24 }
  0xb9   : > { %1767 = vmatpush3.bf16.msra.mxu0 %v1764_v35  ;;  %1544 = vmatprep.mubr.f32.mxu0 %v324_v39 }
  0xba   : > { %1769 = vmatprep.subr.bf16.mxu0 %v1768_v38 }
  0xbd   : > { %1771 = vmatpush3.bf16.msra.mxu0 %v1768_v38  ;;  %v1820_v38 = vpack.c.bf16 %v715_v30, %v714_v29  ;;  %v987_v30 = vld [vmem:[#allocation8 + $0x140] sm:$0xff] }
  0xbe   : > { %1773 = vmatprep.subr.bf16.mxu0 %v1772_v42 }
  0xc1   : > { %1775 = vmatpush3.bf16.msra.mxu0 %v1772_v42 }
  0xc2   : > { %1777 = vmatprep.subr.bf16.mxu0 %v1776_v45 }
  0xc5   : > { %1779 = vmatpush3.bf16.msra.mxu0 %v1776_v45 }
  0xc6   : > { %1781 = vmatprep.subr.bf16.mxu0 %v1780_v48 }
  0xc9   : > { %1783 = vmatpush3.bf16.msra.mxu0 %v1780_v48  ;;  %v719_v48 = vld [vmem:[#allocation8 + $0xb8] sm:$0xff] }
  0xcc   : > { %1545 = vmatmul.mubr.f32.vlgmr.msra.gmra.mrb[0].mxu0 %v325_v49 }
  0xcd   : > { %1547 = vmatprep.mubr.f32.mxu0 %v326_v50 }
  0xd0   : > { %1548 = vmatmul.mubr.f32.gmra.mrb[2].mxu0 %v327_v51  ;;  %v1828_v51 = vpack.c.bf16 %v719_v48, %v718_v47 }
  0xd1   : > { %1550 = vmatprep.mubr.f32.mxu0 %v328_v52  ;;  %v720_v52 = vld [vmem:[#allocation8 + $0xc0] sm:$0xff] }
  0xd4   : > { %1551 = vmatmul.mubr.f32.gmra.mrb[4].mxu0 %v329_v53  ;;  %v721_v53 = vld [vmem:[#allocation8 + $0xc8] sm:$0xff] }
  0xd5   : > { %1553 = vmatprep.mubr.f32.mxu0 %v330_v54  ;;  %v1832_v56 = vpack.c.bf16 %v721_v53, %v720_v52 }
  0xd8   : > { %1554 = vmatmul.mubr.f32.gmra.mrb[6].mxu0 %v331_v55 }
 0x19f   : > { %v1546_v5 = vpop.f32.mrb[0].mxu0 }
 0x1a0   : > { %v2421_v6 = vadd.f32 %v1546_v5, %v1268_v4  ;;  %v641_v7 = vpop.f32.mrb[1].mxu0  ;;  %v981_v5 = vld [vmem:[#allocation8 + $0x110] sm:$0xff] }
 0x1a1   : > { %v2423_v8 = vadd.f32 %v1268_v4, %v641_v7  ;;  %v982_v7 = vld [vmem:[#allocation8 + $0x118] sm:$0xff] }
 0x1a2   : > { %v704_v9 = vmax.f32 %v2421_v6, 0.0  ;;  %v988_v6 = vld [vmem:[#allocation8 + $0x148] sm:$0xff] }
 0x1a3   : > { %v703_v11 = vmax.f32 %v2423_v8, 0.0  ;;  %v1549_v12 = vpop.f32.mrb[2].mxu0  ;;  %v1852_v8 = vpack.c.bf16 %v982_v7, %v981_v5 }
 0x1a4   : > { %729 = vst [vmem:[#allocation2 + $0x9] sm:$0xff] %v704_v9  ;;  %v2429_v14 = vadd.f32 %v1549_v12, %v1268_v4  ;;  %v651_v15 = vpop.f32.mrb[3].mxu0  ;;  %v984_v12 = vld [vmem:[#allocation8 + $0x128] sm:$0xff] }
 0x1a5   : > { %728 = vst [vmem:[#allocation2 + $0x1] sm:$0xff] %v703_v11  ;;  %v2433_v17 = vadd.f32 %v1268_v4, %v651_v15 }
 0x1a6   : > { %v706_v22 = vmax.f32 %v2429_v14, 0.0  ;;  %v990_v14 = vld [vmem:[#allocation8 + $0x158] sm:$0xff] }
 0x1a7   : > { %v705_v23 = vmax.f32 %v2433_v17, 0.0  ;;  %v1552_v25 = vpop.f32.mrb[4].mxu0  ;;  %v989_v17 = vld [vmem:[#allocation8 + $0x150] sm:$0xff] }
 0x1a8   : > { %731 = vst [vmem:[#allocation2 + $0x21] sm:$0xff] %v706_v22  ;;  %v2439_v26 = vadd.f32 %v1552_v25, %v1268_v4  ;;  %v661_v27 = vpop.f32.mrb[5].mxu0  ;;  %v985_v25 = vld [vmem:[#allocation8 + $0x130] sm:$0xff] }
 0x1a9   : > { %730 = vst [vmem:[#allocation2 + $0x19] sm:$0xff] %v705_v23  ;;  %v2443_v28 = vadd.f32 %v1268_v4, %v661_v27  ;;  %v986_v27 = vld [vmem:[#allocation8 + $0x138] sm:$0xff] }
 0x1aa   : > { %v708_v31 = vmax.f32 %v2439_v26, 0.0  ;;  %v1860_v29 = vpack.c.bf16 %v986_v27, %v985_v25 }
 0x1ab   : > { %v707_v32 = vmax.f32 %v2443_v28, 0.0  ;;  %v1555_v33 = vpop.f32.mrb[6].mxu0  ;;  %v991_v28 = vld [vmem:[#allocation8 + $0x160] sm:$0xff] }
 0x1ac   : > { %733 = vst [vmem:[#allocation2 + $0x39] sm:$0xff] %v708_v31  ;;  %v2449_v34 = vadd.f32 %v1555_v33, %v1268_v4  ;;  %v671_v35 = vpop.f32.mrb[7].mxu0  ;;  %v736_v36 = vld [vmem:[#allocation2] sm:$0xff]  ;;  %v737_v37 = vld [vmem:[#allocation2 + $0x8] sm:$0xff]  ;;  %v994_v33 = vld [vmem:[#allocation8 + $0x178] sm:$0xff] }
 0x1ad   : > { %732 = vst [vmem:[#allocation2 + $0x31] sm:$0xff] %v707_v32  ;;  %v2453_v39 = vadd.f32 %v1268_v4, %v671_v35  ;;  %1588 = vmatprep.mubr.f32.mxu1 %v736_v36 }
 0x1ae   : > { %v710_v42 = vmax.f32 %v2449_v34, 0.0  ;;  %1589 = vmatmul.mubr.f32.vlgmr.msra.gmra.mrb[0].mxu1 %v737_v37  ;;  %v745_v34 = vld [vmem:[#allocation2 + $0xa] sm:$0xff] }
 0x1af   : > { %v709_v43 = vmax.f32 %v2453_v39, 0.0  ;;  %1819 = vmatpush3.bf16.msra.mxu1 %v1816_v3  ;;  %v980_v3 = vld [vmem:[#allocation8 + $0x108] sm:$0xff] }
 0x1b0   : > { %735 = vst [vmem:[#allocation2 + $0x51] sm:$0xff] %v710_v42  ;;  %v738_v44 = vld [vmem:[#allocation2 + $0x18] sm:$0xff]  ;;  %1821 = vmatprep.subr.bf16.mxu1 %v1820_v38  ;;  %v739_v45 = vld [vmem:[#allocation2 + $0x20] sm:$0xff]  ;;  %v1848_v4 = vpack.c.bf16 %v980_v3, %v979_v2 }
 0x1b1   : > { %734 = vst [vmem:[#allocation2 + $0x49] sm:$0xff] %v709_v43  ;;  %1591 = vmatprep.mubr.f32.mxu1 %v738_v44  ;;  %v746_v36 = vld [vmem:[#allocation2 + $0x1a] sm:$0xff]  ;;  %v747_v37 = vld [vmem:[#allocation2 + $0x22] sm:$0xff] }
 0x1b2   : > { %1592 = vmatmul.mubr.f32.gmra.mrb[2].mxu1 %v739_v45 }
 0x1b3   : > { %1823 = vmatpush3.bf16.msra.mxu1 %v1820_v38  ;;  %v749_v39 = vld [vmem:[#allocation2 + $0x3a] sm:$0xff] }
 0x1b4   : > { %v740_v49 = vld [vmem:[#allocation2 + $0x30] sm:$0xff]  ;;  %1825 = vmatprep.subr.bf16.mxu1 %v1824_v46  ;;  %v741_v50 = vld [vmem:[#allocation2 + $0x38] sm:$0xff] }
 0x1b5   : > { %1594 = vmatprep.mubr.f32.mxu1 %v740_v49  ;;  %v748_v38 = vld [vmem:[#allocation2 + $0x32] sm:$0xff] }
 0x1b6   : > { %1595 = vmatmul.mubr.f32.gmra.mrb[4].mxu1 %v741_v50 }
 0x1b7   : > { %1827 = vmatpush3.bf16.msra.mxu1 %v1824_v46  ;;  %v751_v41 = vld [vmem:[#allocation2 + $0x52] sm:$0xff] }
 0x1b8   : > { %v742_v54 = vld [vmem:[#allocation2 + $0x48] sm:$0xff]  ;;  %1829 = vmatprep.subr.bf16.mxu1 %v1828_v51  ;;  %v743_v55 = vld [vmem:[#allocation2 + $0x50] sm:$0xff] }
 0x1b9   : > { %1597 = vmatprep.mubr.f32.mxu1 %v742_v54  ;;  %v750_v40 = vld [vmem:[#allocation2 + $0x4a] sm:$0xff] }
 0x1ba   : > { %1598 = vmatmul.mubr.f32.gmra.mrb[6].mxu1 %v743_v55 }
 0x1bb   : > { %1831 = vmatpush3.bf16.msra.mxu1 %v1828_v51  ;;  %1632 = vmatprep.mubr.f32.mxu1 %v703_v11  ;;  %v983_v11 = vld [vmem:[#allocation8 + $0x120] sm:$0xff] }
 0x1bc   : > { %1833 = vmatprep.subr.bf16.mxu1 %v1832_v56  ;;  %v1856_v15 = vpack.c.bf16 %v984_v12, %v983_v11 }
 0x1bf   : > { %1835 = vmatpush3.bf16.msra.mxu1 %v1832_v56 }
 0x1c0   : > { %1837 = vmatprep.subr.bf16.mxu1 %v1836_v59 }
 0x1c3   : > { %1839 = vmatpush3.bf16.msra.mxu1 %v1836_v59 }
 0x1c4   : > { %1841 = vmatprep.subr.bf16.mxu1 %v1840_v62 }
 0x1c7   : > { %1843 = vmatpush3.bf16.msra.mxu1 %v1840_v62 }
 0x1c8   : > { %1845 = vmatprep.subr.bf16.mxu1 %v1844_v1 }
 0x1cb   : > { %1847 = vmatpush3.bf16.msra.mxu1 %v1844_v1 }
 0x1cc   : > { %1849 = vmatprep.subr.bf16.mxu1 %v1848_v4 }
 0x1ce   : > { %1633 = vmatmul.mubr.f32.vlgmr.msra.gmra.mrb[0].mxu1 %v704_v9  ;;  %v1864_v9 = vpack.c.bf16 %v988_v6, %v987_v30 }
 0x1cf   : > { %1635 = vmatprep.mubr.f32.mxu1 %v705_v23  ;;  %1851 = vmatpush3.bf16.msra.mxu1 %v1848_v4  ;;  %v1868_v23 = vpack.c.bf16 %v990_v14, %v989_v17 }
 0x1d0   : > { %1853 = vmatprep.subr.bf16.mxu1 %v1852_v8 }
 0x1d2   : > { %1636 = vmatmul.mubr.f32.gmra.mrb[2].mxu1 %v706_v22  ;;  %v744_v22 = vld [vmem:[#allocation2 + $0x2] sm:$0xff] }
 0x1d3   : > { %1638 = vmatprep.mubr.f32.mxu1 %v707_v32  ;;  %1855 = vmatpush3.bf16.msra.mxu1 %v1852_v8  ;;  %v992_v32 = vld [vmem:[#allocation8 + $0x168] sm:$0xff] }
 0x1d4   : > { %1857 = vmatprep.subr.bf16.mxu1 %v1856_v15  ;;  %v1872_v26 = vpack.c.bf16 %v992_v32, %v991_v28 }
 0x1d6   : > { %1639 = vmatmul.mubr.f32.gmra.mrb[4].mxu1 %v708_v31  ;;  %v993_v31 = vld [vmem:[#allocation8 + $0x170] sm:$0xff] }
 0x1d7   : > { %1641 = vmatprep.mubr.f32.mxu1 %v709_v43  ;;  %1859 = vmatpush3.bf16.msra.mxu1 %v1856_v15  ;;  %v1876_v35 = vpack.c.bf16 %v994_v33, %v993_v31 }
 0x1d8   : > { %1861 = vmatprep.subr.bf16.mxu1 %v1860_v29 }
 0x1da   : > { %1642 = vmatmul.mubr.f32.gmra.mrb[6].mxu1 %v710_v42  ;;  %v1269_v42 = vld [vmem:[%s2555_s4] ss:$0 sm:$0xff] }
 0x1db   : > { %1863 = vmatpush3.bf16.msra.mxu1 %v1860_v29  ;;  %1676 = vmatprep.mubr.f32.mxu1 %v744_v22 }
 0x1dc   : > { %1865 = vmatprep.subr.bf16.mxu1 %v1864_v9 }
 0x1df   : > { %1867 = vmatpush3.bf16.msra.mxu1 %v1864_v9 }
 0x1e0   : > { %1869 = vmatprep.subr.bf16.mxu1 %v1868_v23 }
 0x1e3   : > { %1871 = vmatpush3.bf16.msra.mxu1 %v1868_v23 }
 0x1e4   : > { %1873 = vmatprep.subr.bf16.mxu1 %v1872_v26 }
 0x1e7   : > { %1875 = vmatpush3.bf16.msra.mxu1 %v1872_v26 }
 0x1e8   : > { %1877 = vmatprep.subr.bf16.mxu1 %v1876_v35 }
 0x1eb   : > { %1879 = vmatpush3.bf16.msra.mxu1 %v1876_v35 }
 0x1ee   : > { %1677 = vmatmul.mubr.f32.vlgmr.msra.gmra.mrb[0].mxu1 %v745_v34 }
 0x1ef   : > { %1679 = vmatprep.mubr.f32.mxu1 %v746_v36 }
 0x1f2   : > { %1680 = vmatmul.mubr.f32.gmra.mrb[2].mxu1 %v747_v37 }
 0x1f3   : > { %1682 = vmatprep.mubr.f32.mxu1 %v748_v38 }
 0x1f6   : > { %1683 = vmatmul.mubr.f32.gmra.mrb[4].mxu1 %v749_v39 }
 0x1f7   : > { %1685 = vmatprep.mubr.f32.mxu1 %v750_v40 }
 0x1fa   : > { %1686 = vmatmul.mubr.f32.gmra.mrb[6].mxu1 %v751_v41 }
 0x2c1   : > { %v1678_v43 = vpop.f32.mrb[0].mxu1 }
 0x2c2   : > { %v1116_v44 = vadd.f32 %v1678_v43, %v1269_v42  ;;  %v1061_v45 = vpop.f32.mrb[1].mxu1 }
 0x2c3   : > { %v1115_v46 = vadd.f32 %v1269_v42, %v1061_v45 }
 0x2c4   : > { %v1124_v47 = vadd.f32 %v1116_v44, %v2383_v13 }
 0x2c5   : > { %v1123_v48 = vadd.f32 %v1115_v46, %v2379_v10  ;;  %v1681_v49 = vpop.f32.mrb[2].mxu1 }
 0x2c6   : > { %v1132_v50 = vmax.f32 %v1124_v47, 0.0  ;;  %v1118_v51 = vadd.f32 %v1681_v49, %v1269_v42  ;;  %v1071_v52 = vpop.f32.mrb[3].mxu1 }
 0x2c7   : > { %v1131_v53 = vmax.f32 %v1123_v48, 0.0  ;;  %v1117_v54 = vadd.f32 %v1269_v42, %v1071_v52 }
 0x2c8   : > { %1140 = vst [vmem:[%s2484_s10 + $0x8] sm:$0xff] %v1132_v50  ;;  %v1126_v55 = vadd.f32 %v1118_v51, %v2391_v18 }
 0x2c9   : > { %1139 = vst [vmem:[%s2484_s10] sm:$0xff] %v1131_v53  ;;  %v1125_v10 = vadd.f32 %v1117_v54, %v2387_v16  ;;  %v1684_v13 = vpop.f32.mrb[4].mxu1 }
 0x2ca   : > { %v1134_v56 = vmax.f32 %v1126_v55, 0.0  ;;  %v1120_v57 = vadd.f32 %v1684_v13, %v1269_v42  ;;  %v1081_v58 = vpop.f32.mrb[5].mxu1 }
 0x2cb   : > { %v1133_v59 = vmax.f32 %v1125_v10, 0.0  ;;  %v1119_v60 = vadd.f32 %v1269_v42, %v1081_v58 }
 0x2cc   : > { %1142 = vst [vmem:[%s2484_s10 + $0x18] sm:$0xff] %v1134_v56  ;;  %v1128_v61 = vadd.f32 %v1120_v57, %v2399_v20 }
 0x2cd   : > { %1141 = vst [vmem:[%s2484_s10 + $0x10] sm:$0xff] %v1133_v59  ;;  %v1127_v62 = vadd.f32 %v1119_v60, %v2394_v19  ;;  %v1687_v63 = vpop.f32.mrb[6].mxu1 }
 0x2ce   : > { %v1136_v16 = vmax.f32 %v1128_v61, 0.0  ;;  %v1122_v18 = vadd.f32 %v1687_v63, %v1269_v42  ;;  %v1091_v0 = vpop.f32.mrb[7].mxu1 }
 0x2cf   : > { %v1135_v1 = vmax.f32 %v1127_v62, 0.0  ;;  %v1121_v2 = vadd.f32 %v1269_v42, %v1091_v0 }
 0x2d0   : > { %1144 = vst [vmem:[%s2484_s10 + $0x28] sm:$0xff] %v1136_v16  ;;  %v1130_v3 = vadd.f32 %v1122_v18, %v2407_v24 }
 0x2d1   : > { %1143 = vst [vmem:[%s2484_s10 + $0x20] sm:$0xff] %v1135_v1  ;;  %v1129_v19 = vadd.f32 %v1121_v2, %v2403_v21 }
 0x2d2   : > { %v1138_v20 = vmax.f32 %v1130_v3, 0.0 }
 0x2d3   : > { %v1137_v4 = vmax.f32 %v1129_v19, 0.0 }
 0x2d4   : > { %1146 = vst [vmem:[%s2484_s10 + $0x38] sm:$0xff] %v1138_v20 }
 0x2d5   : > { %1145 = vst [vmem:[%s2484_s10 + $0x30] sm:$0xff] %v1137_v4 }
 0x2d6   : > { %2083 = shalt.err (!%p2080_p1)
}
 0x2d7   : > { %s2084_s12 = scalar_lea.hbm %s2505_s11, 1024  ;;  %s2088_s15 = scalar_lea.hbm %s2556_s5, 2048 }
 0x2d8   : > { %p2085_p13 = scmp.ne.s32.totalorder %s2505_s11, %s2084_s12  ;;  %p2089_p4 = scmp.lt.u32.totalorder %s2505_s11, %s2556_s5 }
 0x2d9   : > { %p2090_p5 = scmp.lt.u32.totalorder %s2088_s15, %s2084_s12  ;;  %p2092_p11 = scmp.lt.u32.totalorder %s2084_s12, %s2505_s11 }
 0x2da   : > { %p2086_p6 = pnand %p2085_p13, %p2570_p0 }
 0x2db   : > { %p2091_p8 = por %p2090_p5, %p2089_p4 }
 0x2dc   : > { %p2087_p10 = pneg %p2086_p6 }
 0x2dd   : > { %p2093_p2 = por %p2092_p11, %p2091_p8 }
 0x2df   : > { %p2094_p3 = pnand %p2093_p2, %p2087_p10 }
 0x2e1   : > { %2097 = shalt.err (!%p2094_p3)
}
 0x2e2   : > { %s2149_s13 = smov 128   ;;  %s2150_s9 = smov 8  }
 0x2e3   : > { %1922 = dma.vmem_to_hbm [thread:$0]  (%p2570_p0), %s2498_s28, 1024, %s2505_s11, %s1148_s22, %s2149_s13, %s2149_s13, %s2150_s9  }
 0x2e4 PF: > { %s1177_s30 = sand.u32 1, %s2128_s18   ;;  %p2571_p7 = scmp.ne.s32.totalorder %s2561_s25, 0 }
 0x2e5   : > { %p2572_p9 = scmp.ge.s32.totalorder %s2140_s21, 2  ;;  %s1178_s17 = scalar_lea.sflag [#allocation5], %s1177_s30 }
 0x2e7   : > { %p1936_p12 = pnand %p2572_p9, %p2571_p7 }
 0x2e9   : > { %2123 = dma.done.wait (!%p1936_p12), %s1178_s17, 1024  }
 0x2ea   : > { %2125 = vsyncadd (!%p1936_p12), %s1178_s17, 4294966272  ;;  %p19_p1 = scmp.ge.s32.totalorder %s2297_s29, 4   ;;  %s2573_s18 = smov %s2132_s19 }
 0x2eb   : > { %s2574_s19 = smov %s2136_s20  ;;  %s2575_s20 = smov %s2313_s27 }
 0x2ec   : > { %s2576_s21 = smov %s2297_s29  ;;  %21 = sbr.rel (!%p19_p1) target bundleno = 6 (0x6), region = 97 }
 0x2f3   :  { %1183 = vsyncpa [#allocation4], 1 }
 0x2f4   :  { %1185 = vsyncpa [#allocation4 + $0x1], 1 }
 0x2f5   :  { %1186 = vsyncpa [#allocation7], 1 }
 0x2f6   :  { %1187 = vsyncpa [#allocation5], 1 }
 0x2f7   :  { %1189 = vsyncpa [#allocation5 + $0x1], 1 }

</bundles_post_ra>
